<compile_context>
chip_gen: v5e
topology: v5e:2x2
jax: 0.10.0
libtpu: 0.0.40
codegen_flags: <defaults>
</compile_context>

<pallas_src>
import functools

import jax
import jax.numpy as jnp
from jax.experimental import pallas as pl
from jax.experimental.pallas import tpu as pltpu


# Explicit scoped-VMEM limit: > v5e's 16 MiB default, == v6e default, safely
# under v7x's 64 MiB physical VMEM.
_VMEM_LIMIT_BYTES = 32 * 1024 * 1024
# Use the MXU ones-matmul reduction when the lane extent is this small.
_MXU_REDUCE_MAX_HW = 512
# Split a single-block case across the grid once it is at least this big.
_MEGACORE_SPLIT_MIN_BYTES = 256 * 1024


def _round_up(v: int, m: int) -> int:
    return (v + m - 1) // m * m


def _sublane_for_dtype(dtype) -> int:
    # Native sublane tile: 8 for 4-byte, 16 for 2-byte, 32 for 1-byte dtypes.
    itemsize = jnp.dtype(dtype).itemsize
    return max(8, 32 // max(1, itemsize))


def _default_block_budget() -> int:
    """Per-input-buffer block budget (x2 for double buffering stays under limit)."""
    try:
        info = pltpu.get_tpu_info()
        vmem = getattr(info, "vmem_capacity_bytes", None)
        if vmem is not None and vmem <= 64 * 1024 * 1024:
            # v7x: smaller blocks -> finer megacore load balance, more headroom.
            return 3 * 1024 * 1024
    except Exception:
        pass
    return 12 * 1024 * 1024


def _row_sum_f32(x, *, use_mxu):
    """Per-row sum along the lane axis, accumulated in f32."""
    if use_mxu:
        ones = jnp.ones((x.shape[-1], 1), dtype=x.dtype)
        return jnp.dot(x, ones, preferred_element_type=jnp.float32)
    return jnp.sum(x, axis=-1, keepdims=True, dtype=jnp.float32)


def _mean_kernel_single(x_ref, o_ref, *, inv_hw, use_mxu):
    # x_ref: (tile_rows, hw) ; o_ref: (tile_rows, 1)
    s = _row_sum_f32(x_ref[...], use_mxu=use_mxu)
    o_ref[...] = (s * inv_hw).astype(o_ref.dtype)


def _mean_kernel_hw_tiled(x_ref, o_ref, acc_ref, *, hw, tile_hw, inv_hw, need_mask):
    # Grid = (row_tiles, hw_tiles); hw axis is the innermost ("arbitrary") one.
    k = pl.program_id(1)
    last = pl.num_programs(1) - 1

    @pl.when(k == 0)
    def _():
        acc_ref[...] = jnp.zeros_like(acc_ref)

    if need_mask:
        # Only the final HW block pays for the iota/compare/select tail mask.
        @pl.when(k != last)
        def _():
            acc_ref[...] += _row_sum_f32(x_ref[...], use_mxu=False)

        @pl.when(k == last)
        def _():
            x = x_ref[...]
            lane = jax.lax.broadcasted_iota(jnp.int32, x.shape, 1)
            valid = (k * tile_hw + lane) < hw
            x = jnp.where(valid, x, jnp.zeros((), x.dtype))
            acc_ref[...] += _row_sum_f32(x, use_mxu=False)
    else:
        acc_ref[...] += _row_sum_f32(x_ref[...], use_mxu=False)

    @pl.when(k == last)
    def _():
        o_ref[...] = (acc_ref[...] * inv_hw).astype(o_ref.dtype)


def spatial_mean_keepdim(x: jax.Array, *, block_budget_bytes: int | None = None) -> jax.Array:
    """Equivalent of torch: x.mean((2, 3), keepdim=True) for an NCHW input."""
    if block_budget_bytes is None:
        block_budget_bytes = _default_block_budget()

    n, c, h, w = x.shape
    rows = n * c
    hw = h * w
    x2 = x.reshape(rows, hw)

    itemsize = jnp.dtype(x.dtype).itemsize
    sublane = _sublane_for_dtype(x.dtype)
    hw_padded = _round_up(hw, 128)            # VMEM lane padding -> real footprint
    bytes_per_row = hw_padded * itemsize
    inv_hw = 1.0 / float(hw)
    use_mxu = (hw <= _MXU_REDUCE_MAX_HW) and jnp.issubdtype(x.dtype, jnp.floating)

    def _cparams(sems):
        return pltpu.CompilerParams(
            dimension_semantics=sems,
            vmem_limit_bytes=_VMEM_LIMIT_BYTES,
        )

    min_row_tile = rows if rows < sublane else sublane   # smallest legal row tile

    if min_row_tile * bytes_per_row <= block_budget_bytes:
        # ---------------- Regime A: full HW per block, tile rows only ----------------
        if rows < sublane:
            tile_rows = rows
        else:
            max_rows_by_vmem = (block_budget_bytes // bytes_per_row) // sublane * sublane
            tile_rows = min(rows, max(sublane, max_rows_by_vmem))

        # If the whole thing would be a single block but it isn't tiny, split the
        # rows into >=4 "parallel" tiles so megacore (v7x) can shard them across
        # both TensorCores and the auto-pipeline overlaps DMA with compute.
        if (
            tile_rows == rows
            and rows >= 2 * sublane
            and rows * bytes_per_row >= _MEGACORE_SPLIT_MIN_BYTES
        ):
            tile_rows = _round_up(pl.cdiv(rows, 4), sublane)

        grid = (pl.cdiv(rows, tile_rows),)
        out2 = pl.pallas_call(
            functools.partial(_mean_kernel_single, inv_hw=inv_hw, use_mxu=use_mxu),
            out_shape=jax.ShapeDtypeStruct((rows, 1), x.dtype),
            grid_spec=pltpu.PrefetchScalarGridSpec(
                num_scalar_prefetch=0,
                grid=grid,
                in_specs=[pl.BlockSpec((tile_rows, hw), lambda i: (i, 0))],
                # Output traffic is rows*itemsize bytes total -> lane-dense rewrite not worth it.
                out_specs=pl.BlockSpec((tile_rows, 1), lambda i: (i, 0)),
            ),
            compiler_params=_cparams(("parallel",)),
        )(x2)
    else:
        # ---------------- Regime B: HW too large for one block -> tile HW ----------------
        tile_rows = min_row_tile
        tile_hw = (block_budget_bytes // (tile_rows * itemsize)) // 128 * 128
        tile_hw = max(128, min(tile_hw, hw_padded))
        need_mask = (hw % tile_hw) != 0
        grid = (pl.cdiv(rows, tile_rows), pl.cdiv(hw, tile_hw))

        out2 = pl.pallas_call(
            functools.partial(
                _mean_kernel_hw_tiled,
                hw=hw, tile_hw=tile_hw, inv_hw=inv_hw, need_mask=need_mask,
            ),
            out_shape=jax.ShapeDtypeStruct((rows, 1), x.dtype),
            grid_spec=pltpu.PrefetchScalarGridSpec(
                num_scalar_prefetch=0,
                grid=grid,
                in_specs=[pl.BlockSpec((tile_rows, tile_hw), lambda i, k: (i, k))],
                out_specs=pl.BlockSpec((tile_rows, 1), lambda i, k: (i, 0)),
                scratch_shapes=[pltpu.VMEM((tile_rows, 1), jnp.float32)],
            ),
            compiler_params=_cparams(("parallel", "arbitrary")),
        )(x2)

    return out2.reshape(n, c, 1, 1)


if __name__ == "__main__":
    root = jax.random.PRNGKey(0)
    k1, k2, k3, k4 = jax.random.split(root, 4)

    # 1) Shape from the original module: x745 = torch.randn([1, 2304, 7, 7]).
    #    rows=2304, hw=49 -> MXU ones-matmul reduce, megacore split -> grid=(4,).
    x = jax.random.normal(k1, (1, 2304, 7, 7), dtype=jnp.float32)
    out = jax.block_until_ready(spatial_mean_keepdim(x))
    ref = jnp.mean(x, axis=(2, 3), keepdims=True)
    assert out.shape == (1, 2304, 1, 1), out.shape
    assert jnp.allclose(out, ref, atol=1e-5, rtol=1e-5), "mismatch (module shape)"

    # 2) Exercise the multi-row-tile path (Regime A, jnp.sum reduce since hw>512)
    #    via a reduced block budget.
    xa = jax.random.normal(k2, (2, 64, 56, 56), dtype=jnp.float32)
    outa = jax.block_until_ready(spatial_mean_keepdim(xa, block_budget_bytes=256 * 1024))
    refa = jnp.mean(xa, axis=(2, 3), keepdims=True)
    assert jnp.allclose(outa, refa, atol=1e-5, rtol=1e-5), "mismatch (row-tiled)"

    # 3) Exercise the HW-tiled accumulator path (Regime B, incl. masked tail)
    #    via a tiny block budget.
    xb = jax.random.normal(k3, (2, 8, 32, 36), dtype=jnp.float32)
    outb = jax.block_until_ready(spatial_mean_keepdim(xb, block_budget_bytes=16 * 1024))
    refb = jnp.mean(xb, axis=(2, 3), keepdims=True)
    assert jnp.allclose(outb, refb, atol=1e-5, rtol=1e-5), "mismatch (hw-tiled)"

    # 4) bf16 path: dtype-aware sublane tiling (16) + MXU reduce, f32 accumulation.
    xc = jax.random.normal(k4, (1, 32, 7, 7), dtype=jnp.bfloat16)
    outc = jax.block_until_ready(spatial_mean_keepdim(xc))
    refc = jnp.mean(xc.astype(jnp.float32), axis=(2, 3), keepdims=True)
    assert jnp.allclose(outc.astype(jnp.float32), refc, atol=1e-2, rtol=1e-2), "mismatch (bf16)"

    print("KERNEL_OK")
</pallas_src>

<mosaic_0001>
module attributes {stable_mosaic.version = 11 : i64} {
  func.func @_mean_kernel_single(%arg0: i32, %arg1: memref<576x49xf32, #tpu.memory_space<vmem>>, %arg2: memref<576x1xf32, #tpu.memory_space<vmem>>) attributes {dimension_semantics = [#tpu.dimension_semantics<parallel>], iteration_bounds = array<i64: 4>, scalar_prefetch = 0 : i64, scratch_operands = 0 : i64, tpu.core_type = #tpu.core_type<tc>, window_params = [{transform_indices = @transform_0, window_bounds = array<i64: 576, 49>}, {transform_indices = @transform_1, window_bounds = array<i64: 576, 1>}]} {
    %c0 = arith.constant 0 : index
    %c0_0 = arith.constant 0 : index
    %0 = vector.load %arg1[%c0, %c0_0] : memref<576x49xf32, #tpu.memory_space<vmem>>, vector<576x49xf32>
    %cst = arith.constant 1.000000e+00 : f32
    %1 = vector.broadcast %cst : f32 to vector<49x1xf32>
    %cst_1 = arith.constant dense<0.000000e+00> : vector<576x1xf32>
    %2 = tpu.matmul %0, %1, %cst_1 {dimension_numbers = #tpu.dot_dimension_numbers<[1], [0], [0], [1], [0, 0, 1, 1], [], []>} : vector<576x49xf32>, vector<49x1xf32>, vector<576x1xf32> -> vector<576x1xf32>
    %cst_2 = arith.constant 0.0204081628 : f32
    %3 = vector.broadcast %cst_2 : f32 to vector<576x1xf32>
    %4 = arith.mulf %2, %3 : vector<576x1xf32>
    %c0_3 = arith.constant 0 : index
    %c0_4 = arith.constant 0 : index
    %5 = vector.load %arg2[%c0_3, %c0_4] : memref<576x1xf32, #tpu.memory_space<vmem>>, vector<576x1xf32>
    tpu.vector_store %arg2[%c0_3, %c0_4], %4 {strides = array<i32>} : memref<576x1xf32, #tpu.memory_space<vmem>>, vector<576x1xf32>,
    return
  }
  func.func @transform_0(%arg0: i32) -> (i32, i32) {
    %c0_i32 = arith.constant 0 : i32
    %c0_i32_0 = arith.constant 0 : i32
    return %arg0, %c0_i32 : i32, i32
  }
  func.func @transform_1(%arg0: i32) -> (i32, i32) {
    %c0_i32 = arith.constant 0 : i32
    %c0_i32_0 = arith.constant 0 : i32
    return %arg0, %c0_i32 : i32, i32
  }
}

</mosaic_0001>

<bundles_post_ra>
// kernel: tpu_custom_call.1
= control target key start
LH: loop header
LB: loop body
LE: loop exit
PB: predicated region body
PF: predicated region fallthrough
CT: control target
= control target key end

     0   :  { %s978_s6 = smov 0   ;;  %s1294_s0 = inlined_call_operand.vmem [shape: f32[2304,49], index: 0, kind: input, shape index: {}]   ;;  %s1295_s1 = inlined_call_operand.vmem [shape: f32[2304,1], index: 1, kind: output, shape index: {}]  }
   0x1 LB: > { %s847_s7 = sadd.s32 4294967295, %s965_s6   ;;  %p851_p0 = scmp.ge.s32.totalorder %s965_s6, 1  ;;  %s965_s6 = sphi %s978_s6, %s11_s6  }
   0x2   : > { %p88_p1 = scmp.lt.s32.totalorder %s965_s6, 5 }
   0x4   : > { %p89_p2 = pnand %p851_p0, %p88_p1 }
   0x5   : > { %s108_s8 = smul.u32 (!%p89_p2), 72, %s847_s7 }
   0x6   : > { %92 = sbr.rel (%p89_p2) target bundleno = 297 (0x129), region = 24 }
   0x7   : > { %p109_p3 = scmp.lt.s32.totalorder (!%p89_p2), %s108_s8, 287 }
   0xb   : > { %vm409_vm0 = vcmask 1040384   ;;  %v967_v0 = vmov 1.0   ;;  %s1297_s8 = smov (!%p109_p3, %s108_s8), 287  ;;  %vm192_vm1 = vcmask 400384   ;;  %vm718_vm2 = vcmask 7168  }
   0xc   : > { %930 = vmatpush.msk.msra.mxu2 %vm409_vm0, %v967_v0  ;;  %931 = vmatpush.msk.msra.mxu3 %vm409_vm0, %v967_v0  ;;  %s852_s9 = sshll.u32 %s1297_s8, 3 }
   0xd   : > { %854 = vmatpush.msk.msra.mxu0 %vm409_vm0, %v967_v0  ;;  %929 = vmatpush.msk.msra.mxu1 %vm409_vm0, %v967_v0  ;;  %s994_s12 = scalar_lea.vmem %s1294_s0, %s852_s9  ;;  %s1131_s15 = scalar_lea.vmem %s1295_s1, %s852_s9 }
   0xe   : > { %933 = vmatpush.msra.mxu2 %v967_v0  ;;  %934 = vmatpush.msra.mxu3 %v967_v0  ;;  %v156_v1 = vld [vmem:[%s994_s12 + $0x120] sm:$0xff]  ;;  %v174_v2 = vld [vmem:[%s994_s12 + $0x1b0] sm:$0xff]  ;;  %v157_v5 = vld [vmem:[%s994_s12 + $0x128] sm:$0xff] }
   0xf   : > { %423 = vmatpush.msra.mxu0 %v967_v0  ;;  %932 = vmatpush.msra.mxu1 %v967_v0  ;;  %v120_v3 = vld [vmem:[%s994_s12] sm:$0xff]  ;;  %v138_v4 = vld [vmem:[%s994_s12 + $0x90] sm:$0xff]  ;;  %v175_v6 = vld [vmem:[%s994_s12 + $0x1b8] sm:$0xff] }
  0x10   : > { %936 = vmatpush.msra.mxu2 %v967_v0  ;;  %937 = vmatpush.msra.mxu3 %v967_v0  ;;  %v121_v7 = vld [vmem:[%s994_s12 + $0x8] sm:$0xff]  ;;  %v139_v8 = vld [vmem:[%s994_s12 + $0x98] sm:$0xff]  ;;  %v158_v9 = vld [vmem:[%s994_s12 + $0x130] sm:$0xff] }
  0x11   : > { %424 = vmatpush.msra.mxu0 %v967_v0  ;;  %935 = vmatpush.msra.mxu1 %v967_v0  ;;  %v176_v10 = vld [vmem:[%s994_s12 + $0x1c0] sm:$0xff]  ;;  %v122_v11 = vld [vmem:[%s994_s12 + $0x10] sm:$0xff]  ;;  %v159_v13 = vld [vmem:[%s994_s12 + $0x138] sm:$0xff] }
  0x12   : > { %939 = vmatpush.msra.mxu2 %v967_v0  ;;  %940 = vmatpush.msra.mxu3 %v967_v0  ;;  %v140_v12 = vld [vmem:[%s994_s12 + $0xa0] sm:$0xff]  ;;  %v177_v14 = vld [vmem:[%s994_s12 + $0x1c8] sm:$0xff]  ;;  %v123_v15 = vld [vmem:[%s994_s12 + $0x18] sm:$0xff] }
  0x13   : > { %425 = vmatpush.msra.mxu0 %v967_v0  ;;  %938 = vmatpush.msra.mxu1 %v967_v0  ;;  %v141_v16 = vld [vmem:[%s994_s12 + $0xa8] sm:$0xff]  ;;  %v160_v17 = vld [vmem:[%s994_s12 + $0x140] sm:$0xff]  ;;  %v178_v18 = vld [vmem:[%s994_s12 + $0x1d0] sm:$0xff] }
  0x14   : > { %942 = vmatpush.msra.mxu2 %v967_v0  ;;  %943 = vmatpush.msra.mxu3 %v967_v0  ;;  %v124_v19 = vld [vmem:[%s994_s12 + $0x20] sm:$0xff]  ;;  %v142_v20 = vld [vmem:[%s994_s12 + $0xb0] sm:$0xff]  ;;  %v161_v21 = vld [vmem:[%s994_s12 + $0x148] sm:$0xff] }
  0x15   : > { %426 = vmatpush.msra.mxu0 %v967_v0  ;;  %941 = vmatpush.msra.mxu1 %v967_v0  ;;  %v179_v22 = vld [vmem:[%s994_s12 + $0x1d8] sm:$0xff]  ;;  %v125_v23 = vld [vmem:[%s994_s12 + $0x28] sm:$0xff]  ;;  %v162_v25 = vld [vmem:[%s994_s12 + $0x150] sm:$0xff] }
  0x16   : > { %945 = vmatpush.msra.mxu2 %v967_v0  ;;  %946 = vmatpush.msra.mxu3 %v967_v0  ;;  %v143_v24 = vld [vmem:[%s994_s12 + $0xb8] sm:$0xff]  ;;  %v180_v26 = vld [vmem:[%s994_s12 + $0x1e0] sm:$0xff]  ;;  %v126_v27 = vld [vmem:[%s994_s12 + $0x30] sm:$0xff] }
  0x17   : > { %427 = vmatpush.msra.mxu0 %v967_v0  ;;  %944 = vmatpush.msra.mxu1 %v967_v0  ;;  %v144_v28 = vld [vmem:[%s994_s12 + $0xc0] sm:$0xff]  ;;  %v163_v29 = vld [vmem:[%s994_s12 + $0x158] sm:$0xff]  ;;  %v181_v30 = vld [vmem:[%s994_s12 + $0x1e8] sm:$0xff] }
  0x18   : > { %948 = vmatpush.msra.mxu2 %v967_v0  ;;  %949 = vmatpush.msra.mxu3 %v967_v0  ;;  %v127_v31 = vld [vmem:[%s994_s12 + $0x38] sm:$0xff]  ;;  %v145_v32 = vld [vmem:[%s994_s12 + $0xc8] sm:$0xff]  ;;  %v164_v33 = vld [vmem:[%s994_s12 + $0x160] sm:$0xff] }
  0x19   : > { %891 = vmatmul.msk.f32.vlgmr.msra.gmra.mxu2 %vm192_vm1, %v156_v1  ;;  %909 = vmatmul.msk.f32.vlgmr.msra.gmra.mxu3 %vm192_vm1, %v174_v2  ;;  %v182_v34 = vld [vmem:[%s994_s12 + $0x1f0] sm:$0xff]  ;;  %v128_v35 = vld [vmem:[%s994_s12 + $0x40] sm:$0xff]  ;;  %v165_v37 = vld [vmem:[%s994_s12 + $0x168] sm:$0xff] }
  0x1a   : > { %428 = vmatpush.msra.mxu0 %v967_v0  ;;  %947 = vmatpush.msra.mxu1 %v967_v0  ;;  %v146_v36 = vld [vmem:[%s994_s12 + $0xd0] sm:$0xff]  ;;  %v183_v38 = vld [vmem:[%s994_s12 + $0x1f8] sm:$0xff]  ;;  %v129_v39 = vld [vmem:[%s994_s12 + $0x48] sm:$0xff] }
  0x1b   : > { %855 = vmatmul.msk.f32.vlgmr.msra.gmra.mxu0 %vm192_vm1, %v120_v3  ;;  %873 = vmatmul.msk.f32.vlgmr.msra.gmra.mxu1 %vm192_vm1, %v138_v4  ;;  %v147_v40 = vld [vmem:[%s994_s12 + $0xd8] sm:$0xff]  ;;  %v166_v41 = vld [vmem:[%s994_s12 + $0x170] sm:$0xff]  ;;  %v184_v42 = vld [vmem:[%s994_s12 + $0x200] sm:$0xff] }
  0x1c   : > { %v130_v43 = vld [vmem:[%s994_s12 + $0x50] sm:$0xff]  ;;  %v148_v44 = vld [vmem:[%s994_s12 + $0xe0] sm:$0xff]  ;;  %v167_v45 = vld [vmem:[%s994_s12 + $0x178] sm:$0xff] }
  0x1d   : > { %v185_v46 = vld [vmem:[%s994_s12 + $0x208] sm:$0xff]  ;;  %v131_v47 = vld [vmem:[%s994_s12 + $0x58] sm:$0xff]  ;;  %v168_v49 = vld [vmem:[%s994_s12 + $0x180] sm:$0xff] }
  0x1e   : > { %v149_v48 = vld [vmem:[%s994_s12 + $0xe8] sm:$0xff]  ;;  %v186_v50 = vld [vmem:[%s994_s12 + $0x210] sm:$0xff]  ;;  %v132_v51 = vld [vmem:[%s994_s12 + $0x60] sm:$0xff] }
  0x1f   : > { %v150_v52 = vld [vmem:[%s994_s12 + $0xf0] sm:$0xff]  ;;  %v169_v53 = vld [vmem:[%s994_s12 + $0x188] sm:$0xff]  ;;  %v187_v54 = vld [vmem:[%s994_s12 + $0x218] sm:$0xff] }
  0x20   : > { %v133_v55 = vld [vmem:[%s994_s12 + $0x68] sm:$0xff]  ;;  %v151_v56 = vld [vmem:[%s994_s12 + $0xf8] sm:$0xff]  ;;  %v170_v57 = vld [vmem:[%s994_s12 + $0x190] sm:$0xff] }
  0x21   : > { %892 = vmatmul.msk.f32.gmra.mxu2 %vm192_vm1, %v157_v5  ;;  %910 = vmatmul.msk.f32.gmra.mxu3 %vm192_vm1, %v175_v6  ;;  %v188_v58 = vld [vmem:[%s994_s12 + $0x220] sm:$0xff]  ;;  %v134_v59 = vld [vmem:[%s994_s12 + $0x70] sm:$0xff]  ;;  %v171_v61 = vld [vmem:[%s994_s12 + $0x198] sm:$0xff] }
  0x22   : > { %v152_v60 = vld [vmem:[%s994_s12 + $0x100] sm:$0xff]  ;;  %v189_v62 = vld [vmem:[%s994_s12 + $0x228] sm:$0xff]  ;;  %v135_v63 = vld [vmem:[%s994_s12 + $0x78] sm:$0xff] }
  0x23   : > { %856 = vmatmul.msk.f32.gmra.mxu0 %vm192_vm1, %v121_v7  ;;  %874 = vmatmul.msk.f32.gmra.mxu1 %vm192_vm1, %v139_v8  ;;  %v153_v0 = vld [vmem:[%s994_s12 + $0x108] sm:$0xff]  ;;  %v172_v1 = vld [vmem:[%s994_s12 + $0x1a0] sm:$0xff]  ;;  %v190_v2 = vld [vmem:[%s994_s12 + $0x230] sm:$0xff] }
  0x24   : > { %v136_v5 = vld [vmem:[%s994_s12 + $0x80] sm:$0xff]  ;;  %v154_v6 = vld [vmem:[%s994_s12 + $0x110] sm:$0xff] }
  0x29   : > { %893 = vmatmul.msk.f32.gmra.mxu2 %vm192_vm1, %v158_v9  ;;  %911 = vmatmul.msk.f32.gmra.mxu3 %vm192_vm1, %v176_v10 }
  0x2b   : > { %857 = vmatmul.msk.f32.gmra.mxu0 %vm192_vm1, %v122_v11  ;;  %875 = vmatmul.msk.f32.gmra.mxu1 %vm192_vm1, %v140_v12 }
  0x31   : > { %894 = vmatmul.msk.f32.gmra.mxu2 %vm192_vm1, %v159_v13  ;;  %912 = vmatmul.msk.f32.gmra.mxu3 %vm192_vm1, %v177_v14  ;;  %v173_v13 = vld [vmem:[%s994_s12 + $0x1a8] sm:$0xff]  ;;  %v191_v14 = vld [vmem:[%s994_s12 + $0x238] sm:$0xff] }
  0x33   : > { %858 = vmatmul.msk.f32.gmra.mxu0 %vm192_vm1, %v123_v15  ;;  %876 = vmatmul.msk.f32.gmra.mxu1 %vm192_vm1, %v141_v16 }
  0x39   : > { %895 = vmatmul.msk.f32.gmra.mxu2 %vm192_vm1, %v160_v17  ;;  %913 = vmatmul.msk.f32.gmra.mxu3 %vm192_vm1, %v178_v18  ;;  %v137_v17 = vld [vmem:[%s994_s12 + $0x88] sm:$0xff]  ;;  %v155_v18 = vld [vmem:[%s994_s12 + $0x118] sm:$0xff] }
  0x3b   : > { %859 = vmatmul.msk.f32.gmra.mxu0 %vm192_vm1, %v124_v19  ;;  %877 = vmatmul.msk.f32.gmra.mxu1 %vm192_vm1, %v142_v20 }
  0x41   : > { %896 = vmatmul.msk.f32.gmra.mxu2 %vm192_vm1, %v161_v21  ;;  %914 = vmatmul.msk.f32.gmra.mxu3 %vm192_vm1, %v179_v22 }
  0x43   : > { %860 = vmatmul.msk.f32.gmra.mxu0 %vm192_vm1, %v125_v23  ;;  %878 = vmatmul.msk.f32.gmra.mxu1 %vm192_vm1, %v143_v24 }
  0x49   : > { %897 = vmatmul.msk.f32.gmra.mxu2 %vm192_vm1, %v162_v25  ;;  %915 = vmatmul.msk.f32.gmra.mxu3 %vm192_vm1, %v180_v26 }
  0x4b   : > { %861 = vmatmul.msk.f32.gmra.mxu0 %vm192_vm1, %v126_v27  ;;  %879 = vmatmul.msk.f32.gmra.mxu1 %vm192_vm1, %v144_v28 }
  0x51   : > { %898 = vmatmul.msk.f32.gmra.mxu2 %vm192_vm1, %v163_v29  ;;  %916 = vmatmul.msk.f32.gmra.mxu3 %vm192_vm1, %v181_v30 }
  0x53   : > { %862 = vmatmul.msk.f32.gmra.mxu0 %vm192_vm1, %v127_v31  ;;  %880 = vmatmul.msk.f32.gmra.mxu1 %vm192_vm1, %v145_v32 }
  0x59   : > { %899 = vmatmul.msk.f32.gmra.mxu2 %vm192_vm1, %v164_v33  ;;  %917 = vmatmul.msk.f32.gmra.mxu3 %vm192_vm1, %v182_v34 }
  0x5b   : > { %863 = vmatmul.msk.f32.gmra.mxu0 %vm192_vm1, %v128_v35  ;;  %881 = vmatmul.msk.f32.gmra.mxu1 %vm192_vm1, %v146_v36 }
  0x61   : > { %900 = vmatmul.msk.f32.gmra.mxu2 %vm192_vm1, %v165_v37  ;;  %918 = vmatmul.msk.f32.gmra.mxu3 %vm192_vm1, %v183_v38 }
  0x63   : > { %864 = vmatmul.msk.f32.gmra.mxu0 %vm192_vm1, %v129_v39  ;;  %882 = vmatmul.msk.f32.gmra.mxu1 %vm192_vm1, %v147_v40 }
  0x69   : > { %901 = vmatmul.msk.f32.gmra.mxu2 %vm192_vm1, %v166_v41  ;;  %919 = vmatmul.msk.f32.gmra.mxu3 %vm192_vm1, %v184_v42 }
  0x6b   : > { %865 = vmatmul.msk.f32.gmra.mxu0 %vm192_vm1, %v130_v43  ;;  %883 = vmatmul.msk.f32.gmra.mxu1 %vm192_vm1, %v148_v44 }
  0x71   : > { %902 = vmatmul.msk.f32.gmra.mxu2 %vm192_vm1, %v167_v45  ;;  %920 = vmatmul.msk.f32.gmra.mxu3 %vm192_vm1, %v185_v46 }
  0x73   : > { %866 = vmatmul.msk.f32.gmra.mxu0 %vm192_vm1, %v131_v47  ;;  %884 = vmatmul.msk.f32.gmra.mxu1 %vm192_vm1, %v149_v48 }
  0x79   : > { %903 = vmatmul.msk.f32.gmra.mxu2 %vm192_vm1, %v168_v49  ;;  %921 = vmatmul.msk.f32.gmra.mxu3 %vm192_vm1, %v186_v50 }
  0x7b   : > { %867 = vmatmul.msk.f32.gmra.mxu0 %vm192_vm1, %v132_v51  ;;  %885 = vmatmul.msk.f32.gmra.mxu1 %vm192_vm1, %v150_v52 }
  0x81   : > { %904 = vmatmul.msk.f32.gmra.mxu2 %vm192_vm1, %v169_v53  ;;  %922 = vmatmul.msk.f32.gmra.mxu3 %vm192_vm1, %v187_v54 }
  0x83   : > { %868 = vmatmul.msk.f32.gmra.mxu0 %vm192_vm1, %v133_v55  ;;  %886 = vmatmul.msk.f32.gmra.mxu1 %vm192_vm1, %v151_v56 }
  0x89   : > { %905 = vmatmul.msk.f32.gmra.mxu2 %vm192_vm1, %v170_v57  ;;  %923 = vmatmul.msk.f32.gmra.mxu3 %vm192_vm1, %v188_v58 }
  0x8b   : > { %869 = vmatmul.msk.f32.gmra.mxu0 %vm192_vm1, %v134_v59  ;;  %887 = vmatmul.msk.f32.gmra.mxu1 %vm192_vm1, %v152_v60 }
  0x91   : > { %906 = vmatmul.msk.f32.gmra.mxu2 %vm192_vm1, %v171_v61  ;;  %924 = vmatmul.msk.f32.gmra.mxu3 %vm192_vm1, %v189_v62 }
  0x93   : > { %870 = vmatmul.msk.f32.gmra.mxu0 %vm192_vm1, %v135_v63  ;;  %888 = vmatmul.msk.f32.gmra.mxu1 %vm192_vm1, %v153_v0 }
  0x98   : > { %v430_v3 = vpop.f32.mrf.mxu0  ;;  %v484_v4 = vpop.f32.mrf.mxu1 }
  0x99   : > { %907 = vmatmul.msk.f32.gmra.mxu2 %vm192_vm1, %v172_v1  ;;  %925 = vmatmul.msk.f32.gmra.mxu3 %vm192_vm1, %v190_v2  ;;  %v646_v7 = vmul.f32 0.020408163, %v430_v3  ;;  %v664_v8 = vmul.f32 0.020408163, %v484_v4 }
  0x9b   : > { %719 = vst.msk [vmem:[%s1131_s15] sm:$0xff] %vm718_vm2, %v646_v7  ;;  %871 = vmatmul.msk.f32.gmra.mxu0 %vm192_vm1, %v136_v5  ;;  %889 = vmatmul.msk.f32.gmra.mxu1 %vm192_vm1, %v154_v6 }
  0x9c   : > { %737 = vst.msk [vmem:[%s1131_s15 + $0x90] sm:$0xff] %vm718_vm2, %v664_v8  ;;  %v538_v9 = vpop.f32.mrf.mxu2  ;;  %v592_v10 = vpop.f32.mrf.mxu3 }
  0x9d   : > { %v682_v11 = vmul.f32 0.020408163, %v538_v9  ;;  %v700_v12 = vmul.f32 0.020408163, %v592_v10 }
  0x9f   : > { %755 = vst.msk [vmem:[%s1131_s15 + $0x120] sm:$0xff] %vm718_vm2, %v682_v11 }
  0xa0   : > { %773 = vst.msk [vmem:[%s1131_s15 + $0x1b0] sm:$0xff] %vm718_vm2, %v700_v12  ;;  %v433_v15 = vpop.f32.mrf.mxu0  ;;  %v487_v16 = vpop.f32.mrf.mxu1 }
  0xa1   : > { %908 = vmatmul.msk.f32.gmra.mxu2 %vm192_vm1, %v173_v13  ;;  %926 = vmatmul.msk.f32.gmra.mxu3 %vm192_vm1, %v191_v14  ;;  %v647_v19 = vmul.f32 0.020408163, %v433_v15  ;;  %v665_v20 = vmul.f32 0.020408163, %v487_v16 }
  0xa3   : > { %720 = vst.msk [vmem:[%s1131_s15 + $0x8] sm:$0xff] %vm718_vm2, %v647_v19  ;;  %872 = vmatmul.msk.f32.gmra.mxu0 %vm192_vm1, %v137_v17  ;;  %890 = vmatmul.msk.f32.gmra.mxu1 %vm192_vm1, %v155_v18 }
  0xa4   : > { %738 = vst.msk [vmem:[%s1131_s15 + $0x98] sm:$0xff] %vm718_vm2, %v665_v20  ;;  %v541_v21 = vpop.f32.mrf.mxu2  ;;  %v595_v22 = vpop.f32.mrf.mxu3 }
  0xa5   : > { %v683_v23 = vmul.f32 0.020408163, %v541_v21  ;;  %v701_v24 = vmul.f32 0.020408163, %v595_v22 }
  0xa7   : > { %756 = vst.msk [vmem:[%s1131_s15 + $0x128] sm:$0xff] %vm718_vm2, %v683_v23 }
  0xa8   : > { %774 = vst.msk [vmem:[%s1131_s15 + $0x1b8] sm:$0xff] %vm718_vm2, %v701_v24  ;;  %v436_v25 = vpop.f32.mrf.mxu0  ;;  %v490_v26 = vpop.f32.mrf.mxu1 }
  0xa9   : > { %v648_v27 = vmul.f32 0.020408163, %v436_v25  ;;  %v666_v28 = vmul.f32 0.020408163, %v490_v26 }
  0xab   : > { %721 = vst.msk [vmem:[%s1131_s15 + $0x10] sm:$0xff] %vm718_vm2, %v648_v27 }
  0xac   : > { %739 = vst.msk [vmem:[%s1131_s15 + $0xa0] sm:$0xff] %vm718_vm2, %v666_v28  ;;  %v544_v29 = vpop.f32.mrf.mxu2  ;;  %v598_v30 = vpop.f32.mrf.mxu3 }
  0xad   : > { %v684_v31 = vmul.f32 0.020408163, %v544_v29  ;;  %v702_v32 = vmul.f32 0.020408163, %v598_v30 }
  0xaf   : > { %757 = vst.msk [vmem:[%s1131_s15 + $0x130] sm:$0xff] %vm718_vm2, %v684_v31 }
  0xb0   : > { %775 = vst.msk [vmem:[%s1131_s15 + $0x1c0] sm:$0xff] %vm718_vm2, %v702_v32  ;;  %v439_v33 = vpop.f32.mrf.mxu0  ;;  %v493_v34 = vpop.f32.mrf.mxu1 }
  0xb1   : > { %v649_v35 = vmul.f32 0.020408163, %v439_v33  ;;  %v667_v36 = vmul.f32 0.020408163, %v493_v34 }
  0xb3   : > { %722 = vst.msk [vmem:[%s1131_s15 + $0x18] sm:$0xff] %vm718_vm2, %v649_v35 }
  0xb4   : > { %740 = vst.msk [vmem:[%s1131_s15 + $0xa8] sm:$0xff] %vm718_vm2, %v667_v36  ;;  %v547_v37 = vpop.f32.mrf.mxu2  ;;  %v601_v38 = vpop.f32.mrf.mxu3 }
  0xb5   : > { %v685_v39 = vmul.f32 0.020408163, %v547_v37  ;;  %v703_v40 = vmul.f32 0.020408163, %v601_v38 }
  0xb7   : > { %758 = vst.msk [vmem:[%s1131_s15 + $0x138] sm:$0xff] %vm718_vm2, %v685_v39 }
  0xb8   : > { %776 = vst.msk [vmem:[%s1131_s15 + $0x1c8] sm:$0xff] %vm718_vm2, %v703_v40  ;;  %v442_v41 = vpop.f32.mrf.mxu0  ;;  %v496_v42 = vpop.f32.mrf.mxu1 }
  0xb9   : > { %v650_v43 = vmul.f32 0.020408163, %v442_v41  ;;  %v668_v44 = vmul.f32 0.020408163, %v496_v42 }
  0xbb   : > { %723 = vst.msk [vmem:[%s1131_s15 + $0x20] sm:$0xff] %vm718_vm2, %v650_v43 }
  0xbc   : > { %741 = vst.msk [vmem:[%s1131_s15 + $0xb0] sm:$0xff] %vm718_vm2, %v668_v44  ;;  %v550_v45 = vpop.f32.mrf.mxu2  ;;  %v604_v46 = vpop.f32.mrf.mxu3 }
  0xbd   : > { %v686_v47 = vmul.f32 0.020408163, %v550_v45  ;;  %v704_v48 = vmul.f32 0.020408163, %v604_v46 }
  0xbf   : > { %759 = vst.msk [vmem:[%s1131_s15 + $0x140] sm:$0xff] %vm718_vm2, %v686_v47 }
  0xc0   : > { %777 = vst.msk [vmem:[%s1131_s15 + $0x1d0] sm:$0xff] %vm718_vm2, %v704_v48  ;;  %v445_v49 = vpop.f32.mrf.mxu0  ;;  %v499_v50 = vpop.f32.mrf.mxu1 }
  0xc1   : > { %v651_v51 = vmul.f32 0.020408163, %v445_v49  ;;  %v669_v52 = vmul.f32 0.020408163, %v499_v50 }
  0xc3   : > { %724 = vst.msk [vmem:[%s1131_s15 + $0x28] sm:$0xff] %vm718_vm2, %v651_v51 }
  0xc4   : > { %742 = vst.msk [vmem:[%s1131_s15 + $0xb8] sm:$0xff] %vm718_vm2, %v669_v52  ;;  %v553_v53 = vpop.f32.mrf.mxu2  ;;  %v607_v54 = vpop.f32.mrf.mxu3 }
  0xc5   : > { %v687_v55 = vmul.f32 0.020408163, %v553_v53  ;;  %v705_v56 = vmul.f32 0.020408163, %v607_v54 }
  0xc7   : > { %760 = vst.msk [vmem:[%s1131_s15 + $0x148] sm:$0xff] %vm718_vm2, %v687_v55 }
  0xc8   : > { %778 = vst.msk [vmem:[%s1131_s15 + $0x1d8] sm:$0xff] %vm718_vm2, %v705_v56  ;;  %v448_v57 = vpop.f32.mrf.mxu0  ;;  %v502_v58 = vpop.f32.mrf.mxu1 }
  0xc9   : > { %v652_v59 = vmul.f32 0.020408163, %v448_v57  ;;  %v670_v60 = vmul.f32 0.020408163, %v502_v58 }
  0xcb   : > { %725 = vst.msk [vmem:[%s1131_s15 + $0x30] sm:$0xff] %vm718_vm2, %v652_v59 }
  0xcc   : > { %743 = vst.msk [vmem:[%s1131_s15 + $0xc0] sm:$0xff] %vm718_vm2, %v670_v60  ;;  %v556_v61 = vpop.f32.mrf.mxu2  ;;  %v610_v62 = vpop.f32.mrf.mxu3 }
  0xcd   : > { %v688_v63 = vmul.f32 0.020408163, %v556_v61  ;;  %v706_v0 = vmul.f32 0.020408163, %v610_v62 }
  0xcf   : > { %761 = vst.msk [vmem:[%s1131_s15 + $0x150] sm:$0xff] %vm718_vm2, %v688_v63 }
  0xd0   : > { %779 = vst.msk [vmem:[%s1131_s15 + $0x1e0] sm:$0xff] %vm718_vm2, %v706_v0  ;;  %v451_v1 = vpop.f32.mrf.mxu0  ;;  %v505_v2 = vpop.f32.mrf.mxu1 }
  0xd1   : > { %v653_v3 = vmul.f32 0.020408163, %v451_v1  ;;  %v671_v4 = vmul.f32 0.020408163, %v505_v2 }
  0xd3   : > { %726 = vst.msk [vmem:[%s1131_s15 + $0x38] sm:$0xff] %vm718_vm2, %v653_v3 }
  0xd4   : > { %744 = vst.msk [vmem:[%s1131_s15 + $0xc8] sm:$0xff] %vm718_vm2, %v671_v4  ;;  %v559_v5 = vpop.f32.mrf.mxu2  ;;  %v613_v6 = vpop.f32.mrf.mxu3 }
  0xd5   : > { %v689_v7 = vmul.f32 0.020408163, %v559_v5  ;;  %v707_v8 = vmul.f32 0.020408163, %v613_v6 }
  0xd7   : > { %762 = vst.msk [vmem:[%s1131_s15 + $0x158] sm:$0xff] %vm718_vm2, %v689_v7 }
  0xd8   : > { %780 = vst.msk [vmem:[%s1131_s15 + $0x1e8] sm:$0xff] %vm718_vm2, %v707_v8  ;;  %v454_v9 = vpop.f32.mrf.mxu0  ;;  %v508_v10 = vpop.f32.mrf.mxu1 }
  0xd9   : > { %v654_v11 = vmul.f32 0.020408163, %v454_v9  ;;  %v672_v12 = vmul.f32 0.020408163, %v508_v10 }
  0xdb   : > { %727 = vst.msk [vmem:[%s1131_s15 + $0x40] sm:$0xff] %vm718_vm2, %v654_v11 }
  0xdc   : > { %745 = vst.msk [vmem:[%s1131_s15 + $0xd0] sm:$0xff] %vm718_vm2, %v672_v12  ;;  %v562_v13 = vpop.f32.mrf.mxu2  ;;  %v616_v14 = vpop.f32.mrf.mxu3 }
  0xdd   : > { %v690_v15 = vmul.f32 0.020408163, %v562_v13  ;;  %v708_v16 = vmul.f32 0.020408163, %v616_v14 }
  0xdf   : > { %763 = vst.msk [vmem:[%s1131_s15 + $0x160] sm:$0xff] %vm718_vm2, %v690_v15 }
  0xe0   : > { %781 = vst.msk [vmem:[%s1131_s15 + $0x1f0] sm:$0xff] %vm718_vm2, %v708_v16  ;;  %v457_v17 = vpop.f32.mrf.mxu0  ;;  %v511_v18 = vpop.f32.mrf.mxu1 }
  0xe1   : > { %v655_v19 = vmul.f32 0.020408163, %v457_v17  ;;  %v673_v20 = vmul.f32 0.020408163, %v511_v18 }
  0xe3   : > { %728 = vst.msk [vmem:[%s1131_s15 + $0x48] sm:$0xff] %vm718_vm2, %v655_v19 }
  0xe4   : > { %746 = vst.msk [vmem:[%s1131_s15 + $0xd8] sm:$0xff] %vm718_vm2, %v673_v20  ;;  %v565_v21 = vpop.f32.mrf.mxu2  ;;  %v619_v22 = vpop.f32.mrf.mxu3 }
  0xe5   : > { %v691_v23 = vmul.f32 0.020408163, %v565_v21  ;;  %v709_v24 = vmul.f32 0.020408163, %v619_v22 }
  0xe7   : > { %764 = vst.msk [vmem:[%s1131_s15 + $0x168] sm:$0xff] %vm718_vm2, %v691_v23 }
  0xe8   : > { %782 = vst.msk [vmem:[%s1131_s15 + $0x1f8] sm:$0xff] %vm718_vm2, %v709_v24  ;;  %v460_v25 = vpop.f32.mrf.mxu0  ;;  %v514_v26 = vpop.f32.mrf.mxu1 }
  0xe9   : > { %v656_v27 = vmul.f32 0.020408163, %v460_v25  ;;  %v674_v28 = vmul.f32 0.020408163, %v514_v26 }
  0xeb   : > { %729 = vst.msk [vmem:[%s1131_s15 + $0x50] sm:$0xff] %vm718_vm2, %v656_v27 }
  0xec   : > { %747 = vst.msk [vmem:[%s1131_s15 + $0xe0] sm:$0xff] %vm718_vm2, %v674_v28  ;;  %v568_v29 = vpop.f32.mrf.mxu2  ;;  %v622_v30 = vpop.f32.mrf.mxu3 }
  0xed   : > { %v692_v31 = vmul.f32 0.020408163, %v568_v29  ;;  %v710_v32 = vmul.f32 0.020408163, %v622_v30 }
  0xef   : > { %765 = vst.msk [vmem:[%s1131_s15 + $0x170] sm:$0xff] %vm718_vm2, %v692_v31 }
  0xf0   : > { %783 = vst.msk [vmem:[%s1131_s15 + $0x200] sm:$0xff] %vm718_vm2, %v710_v32  ;;  %v463_v33 = vpop.f32.mrf.mxu0  ;;  %v517_v34 = vpop.f32.mrf.mxu1 }
  0xf1   : > { %v657_v35 = vmul.f32 0.020408163, %v463_v33  ;;  %v675_v36 = vmul.f32 0.020408163, %v517_v34 }
  0xf3   : > { %730 = vst.msk [vmem:[%s1131_s15 + $0x58] sm:$0xff] %vm718_vm2, %v657_v35 }
  0xf4   : > { %748 = vst.msk [vmem:[%s1131_s15 + $0xe8] sm:$0xff] %vm718_vm2, %v675_v36  ;;  %v571_v37 = vpop.f32.mrf.mxu2  ;;  %v625_v38 = vpop.f32.mrf.mxu3 }
  0xf5   : > { %v693_v39 = vmul.f32 0.020408163, %v571_v37  ;;  %v711_v40 = vmul.f32 0.020408163, %v625_v38 }
  0xf7   : > { %766 = vst.msk [vmem:[%s1131_s15 + $0x178] sm:$0xff] %vm718_vm2, %v693_v39 }
  0xf8   : > { %784 = vst.msk [vmem:[%s1131_s15 + $0x208] sm:$0xff] %vm718_vm2, %v711_v40  ;;  %v466_v41 = vpop.f32.mrf.mxu0  ;;  %v520_v42 = vpop.f32.mrf.mxu1 }
  0xf9   : > { %v658_v43 = vmul.f32 0.020408163, %v466_v41  ;;  %v676_v44 = vmul.f32 0.020408163, %v520_v42 }
  0xfb   : > { %731 = vst.msk [vmem:[%s1131_s15 + $0x60] sm:$0xff] %vm718_vm2, %v658_v43 }
  0xfc   : > { %749 = vst.msk [vmem:[%s1131_s15 + $0xf0] sm:$0xff] %vm718_vm2, %v676_v44  ;;  %v574_v45 = vpop.f32.mrf.mxu2  ;;  %v628_v46 = vpop.f32.mrf.mxu3 }
  0xfd   : > { %v694_v47 = vmul.f32 0.020408163, %v574_v45  ;;  %v712_v48 = vmul.f32 0.020408163, %v628_v46 }
  0xff   : > { %767 = vst.msk [vmem:[%s1131_s15 + $0x180] sm:$0xff] %vm718_vm2, %v694_v47 }
 0x100   : > { %785 = vst.msk [vmem:[%s1131_s15 + $0x210] sm:$0xff] %vm718_vm2, %v712_v48  ;;  %v469_v49 = vpop.f32.mrf.mxu0  ;;  %v523_v50 = vpop.f32.mrf.mxu1 }
 0x101   : > { %v659_v51 = vmul.f32 0.020408163, %v469_v49  ;;  %v677_v52 = vmul.f32 0.020408163, %v523_v50 }
 0x103   : > { %732 = vst.msk [vmem:[%s1131_s15 + $0x68] sm:$0xff] %vm718_vm2, %v659_v51 }
 0x104   : > { %750 = vst.msk [vmem:[%s1131_s15 + $0xf8] sm:$0xff] %vm718_vm2, %v677_v52  ;;  %v577_v53 = vpop.f32.mrf.mxu2  ;;  %v631_v54 = vpop.f32.mrf.mxu3 }
 0x105   : > { %v695_v55 = vmul.f32 0.020408163, %v577_v53  ;;  %v713_v56 = vmul.f32 0.020408163, %v631_v54 }
 0x107   : > { %768 = vst.msk [vmem:[%s1131_s15 + $0x188] sm:$0xff] %vm718_vm2, %v695_v55 }
 0x108   : > { %786 = vst.msk [vmem:[%s1131_s15 + $0x218] sm:$0xff] %vm718_vm2, %v713_v56  ;;  %v472_v57 = vpop.f32.mrf.mxu0  ;;  %v526_v58 = vpop.f32.mrf.mxu1 }
 0x109   : > { %v660_v59 = vmul.f32 0.020408163, %v472_v57  ;;  %v678_v60 = vmul.f32 0.020408163, %v526_v58 }
 0x10b   : > { %733 = vst.msk [vmem:[%s1131_s15 + $0x70] sm:$0xff] %vm718_vm2, %v660_v59 }
 0x10c   : > { %751 = vst.msk [vmem:[%s1131_s15 + $0x100] sm:$0xff] %vm718_vm2, %v678_v60  ;;  %v580_v61 = vpop.f32.mrf.mxu2  ;;  %v634_v62 = vpop.f32.mrf.mxu3 }
 0x10d   : > { %v696_v63 = vmul.f32 0.020408163, %v580_v61  ;;  %v714_v0 = vmul.f32 0.020408163, %v634_v62 }
 0x10f   : > { %769 = vst.msk [vmem:[%s1131_s15 + $0x190] sm:$0xff] %vm718_vm2, %v696_v63 }
 0x110   : > { %787 = vst.msk [vmem:[%s1131_s15 + $0x220] sm:$0xff] %vm718_vm2, %v714_v0  ;;  %v475_v1 = vpop.f32.mrf.mxu0  ;;  %v529_v2 = vpop.f32.mrf.mxu1 }
 0x111   : > { %v661_v3 = vmul.f32 0.020408163, %v475_v1  ;;  %v679_v4 = vmul.f32 0.020408163, %v529_v2 }
 0x113   : > { %734 = vst.msk [vmem:[%s1131_s15 + $0x78] sm:$0xff] %vm718_vm2, %v661_v3 }
 0x114   : > { %752 = vst.msk [vmem:[%s1131_s15 + $0x108] sm:$0xff] %vm718_vm2, %v679_v4  ;;  %v583_v5 = vpop.f32.mrf.mxu2  ;;  %v637_v6 = vpop.f32.mrf.mxu3 }
 0x115   : > { %v697_v7 = vmul.f32 0.020408163, %v583_v5  ;;  %v715_v8 = vmul.f32 0.020408163, %v637_v6 }
 0x117   : > { %770 = vst.msk [vmem:[%s1131_s15 + $0x198] sm:$0xff] %vm718_vm2, %v697_v7 }
 0x118   : > { %788 = vst.msk [vmem:[%s1131_s15 + $0x228] sm:$0xff] %vm718_vm2, %v715_v8  ;;  %v478_v9 = vpop.f32.mrf.mxu0  ;;  %v532_v10 = vpop.f32.mrf.mxu1 }
 0x119   : > { %v662_v11 = vmul.f32 0.020408163, %v478_v9  ;;  %v680_v12 = vmul.f32 0.020408163, %v532_v10 }
 0x11b   : > { %735 = vst.msk [vmem:[%s1131_s15 + $0x80] sm:$0xff] %vm718_vm2, %v662_v11 }
 0x11c   : > { %753 = vst.msk [vmem:[%s1131_s15 + $0x110] sm:$0xff] %vm718_vm2, %v680_v12  ;;  %v586_v13 = vpop.f32.mrf.mxu2  ;;  %v640_v14 = vpop.f32.mrf.mxu3 }
 0x11d   : > { %v698_v15 = vmul.f32 0.020408163, %v586_v13  ;;  %v716_v16 = vmul.f32 0.020408163, %v640_v14 }
 0x11f   : > { %771 = vst.msk [vmem:[%s1131_s15 + $0x1a0] sm:$0xff] %vm718_vm2, %v698_v15 }
 0x120   : > { %789 = vst.msk [vmem:[%s1131_s15 + $0x230] sm:$0xff] %vm718_vm2, %v716_v16  ;;  %v481_v17 = vpop.f32.mrf.mxu0  ;;  %v535_v18 = vpop.f32.mrf.mxu1 }
 0x121   : > { %v663_v19 = vmul.f32 0.020408163, %v481_v17  ;;  %v681_v20 = vmul.f32 0.020408163, %v535_v18 }
 0x123   : > { %736 = vst.msk [vmem:[%s1131_s15 + $0x88] sm:$0xff] %vm718_vm2, %v663_v19 }
 0x124   : > { %754 = vst.msk [vmem:[%s1131_s15 + $0x118] sm:$0xff] %vm718_vm2, %v681_v20  ;;  %v589_v21 = vpop.f32.mrf.mxu2  ;;  %v643_v22 = vpop.f32.mrf.mxu3 }
 0x125   : > { %v699_v23 = vmul.f32 0.020408163, %v589_v21  ;;  %v717_v24 = vmul.f32 0.020408163, %v643_v22 }
 0x127   : > { %772 = vst.msk [vmem:[%s1131_s15 + $0x1a8] sm:$0xff] %vm718_vm2, %v699_v23 }
 0x128   : > { %790 = vst.msk [vmem:[%s1131_s15 + $0x238] sm:$0xff] %vm718_vm2, %v717_v24 }
 0x129 PF: > { %s11_s6 = sadd.s32 1, %s965_s6  }
 0x12a   : > { %p8_p4 = scmp.ge.s32.totalorder %s11_s6, 6  }
 0x12c   :  { %10 = sbr.rel (!%p8_p4) target bundleno = 1 (0x1), region = 54 }

</bundles_post_ra>
